<compile_context>
chip_gen: v5e
topology: v5e:2x2
jax: 0.10.0
libtpu: 0.0.40
codegen_flags: <defaults>
</compile_context>

<pallas_src>
import functools
import math

import jax
import jax.numpy as jnp
from jax.experimental import pallas as pl
from jax.experimental.pallas import tpu as pltpu


def _recon_loss_rows_kernel(r_ref, x_ref, out_ref, acc_ref, *,
                            row_tile, tiles_per_chunk, rows_total, need_mask):
    """Fast path. Inputs viewed as a dense (rows, 128) slab.

    grid = (num_chunks [parallel], tiles_per_chunk [arbitrary]).
      r_ref, x_ref : (row_tile, 128) input blocks
      out_ref      : (1, 1) SMEM block -> per-chunk partial sum
      acc_ref      : (1, 128) f32 VMEM running accumulator for this chunk
    """
    j = pl.program_id(1)

    @pl.when(j == 0)
    def _():
        acc_ref[...] = jnp.zeros_like(acc_ref)

    d = r_ref[...].astype(jnp.float32) - x_ref[...].astype(jnp.float32)

    if need_mask:
        # Mask rows past the end of the (rows, 128) view. The index_map clamps
        # overflow tiles onto a valid block, so OOB/garbage data never leaks
        # into the sum.
        i = pl.program_id(0)
        t = i * tiles_per_chunk + j                       # unclamped tile index
        row = jax.lax.broadcasted_iota(jnp.int32, d.shape, 0) + t * row_tile
        d = jnp.where(row < rows_total, d, 0.0)

    # Defer the cross-lane reduce + scalar SMEM write to the last step: per-step
    # work is just vector adds into a lane vector.
    acc_ref[...] += jnp.sum(d * d, axis=0, keepdims=True)

    @pl.when(j == tiles_per_chunk - 1)
    def _():
        out_ref[0, 0] = jnp.sum(acc_ref[...])


def _recon_loss_bf_kernel(r_ref, x_ref, out_ref, *, tile_f, f_total, need_mask):
    """Fallback path ((B, F) layout) when total elems is not a multiple of 128.

    grid = (n_feature_tiles [arbitrary]); out_ref is a (1,1) SMEM accumulator.
    """
    i = pl.program_id(0)

    @pl.when(i == 0)
    def _():
        out_ref[0, 0] = jnp.float32(0.0)

    d = r_ref[...].astype(jnp.float32) - x_ref[...].astype(jnp.float32)
    if need_mask:
        col = jax.lax.broadcasted_iota(jnp.int32, d.shape, 1) + i * tile_f
        d = jnp.where(col < f_total, d, 0.0)

    out_ref[0, 0] += jnp.sum(d * d)


def reconstruction_loss(reconstructed_inputs, original_inputs,
                        batch_averaged=True, row_tile=4096, num_partials=8):
    """Pallas implementation of ReconstructionLoss.forward.

    Args:
      reconstructed_inputs: [B, C, H, W] (any dtype; accumulated in f32).
      original_inputs:      [B, C, H, W]
      batch_averaged:       mean over batch if True, else sum.
      row_tile:             sublane rows per block in the fast path
                            (4096 rows x 128 lanes x f32 = 2 MiB / input block).
      num_partials:         max number of parallel partial sums (megacore).
    Returns:
      scalar float32 loss.
    """
    assert reconstructed_inputs.shape == original_inputs.shape
    b = reconstructed_inputs.shape[0]
    n = math.prod(reconstructed_inputs.shape)
    scale = (1.0 / b) if batch_averaged else 1.0

    if n % 128 == 0 and n > 0:
        # ---- Fast path: dense (rows, 128) view, free reshape (contiguous). ----
        rows = n // 128
        r = reconstructed_inputs.reshape(rows, 128)
        x = original_inputs.reshape(rows, 128)

        if rows <= row_tile:
            rt = rows                       # full-dim block (always legal)
        else:
            rt = max(8, (row_tile // 8) * 8)  # sublane-aligned big block

        total_tiles = pl.cdiv(rows, rt)
        num_chunks = max(1, min(num_partials, total_tiles))
        tiles_per_chunk = pl.cdiv(total_tiles, num_chunks)
        covered_rows = num_chunks * tiles_per_chunk * rt
        need_mask = covered_rows != rows
        overflow = num_chunks * tiles_per_chunk > total_tiles

        if overflow:
            # Overflow tiles are clamped to a valid block (no OOB DMA) and
            # fully masked inside the kernel.
            def in_idx(i, j):
                return (jnp.minimum(i * tiles_per_chunk + j, total_tiles - 1), 0)
        else:
            def in_idx(i, j):
                return (i * tiles_per_chunk + j, 0)

        kernel = functools.partial(
            _recon_loss_rows_kernel, row_tile=rt,
            tiles_per_chunk=tiles_per_chunk, rows_total=rows,
            need_mask=need_mask)

        partials = pl.pallas_call(
            kernel,
            out_shape=jax.ShapeDtypeStruct((num_chunks, 1), jnp.float32),
            grid_spec=pltpu.PrefetchScalarGridSpec(
                num_scalar_prefetch=0,
                grid=(num_chunks, tiles_per_chunk),
                in_specs=[pl.BlockSpec((rt, 128), in_idx),
                          pl.BlockSpec((rt, 128), in_idx)],
                out_specs=pl.BlockSpec((1, 1), lambda i, j: (i, 0),
                                       memory_space=pltpu.SMEM),
                scratch_shapes=[pltpu.VMEM((1, 128), jnp.float32)]),
            compiler_params=pltpu.CompilerParams(
                dimension_semantics=("parallel", "arbitrary"),
                vmem_limit_bytes=32 * 1024 * 1024),
        )(r, x)
        return jnp.sum(partials) * jnp.float32(scale)

    # ---- Fallback: element count not a multiple of 128 lanes. --------------
    # Work on the (B, F) view, tile the feature axis, mask any tail lanes.
    f = n // b
    r = reconstructed_inputs.reshape(b, f)
    x = original_inputs.reshape(b, f)

    target = max(128, ((512 * 1024) // max(b, 1)) // 128 * 128)  # ~2 MiB block
    if target >= f:
        tile_f = f                 # full-dim block, no partial tiles, no mask
        need_mask = False
    else:
        tile_f = target
        need_mask = (f % tile_f) != 0
    n_tiles = pl.cdiv(f, tile_f)

    kernel = functools.partial(_recon_loss_bf_kernel, tile_f=tile_f,
                               f_total=f, need_mask=need_mask)
    out = pl.pallas_call(
        kernel,
        out_shape=jax.ShapeDtypeStruct((1, 1), jnp.float32),
        grid_spec=pltpu.PrefetchScalarGridSpec(
            num_scalar_prefetch=0,
            grid=(n_tiles,),
            in_specs=[pl.BlockSpec((b, tile_f), lambda i: (0, i)),
                      pl.BlockSpec((b, tile_f), lambda i: (0, i))],
            out_specs=pl.BlockSpec((1, 1), lambda i: (0, 0),
                                   memory_space=pltpu.SMEM)),
        compiler_params=pltpu.CompilerParams(
            dimension_semantics=("arbitrary",),
            vmem_limit_bytes=32 * 1024 * 1024),
    )(r, x)
    return out[0, 0] * jnp.float32(scale)


def _reference(recon, orig, batch_averaged=True):
    b = recon.shape[0]
    r = recon.reshape(b, -1).astype(jnp.float32)
    x = orig.reshape(b, -1).astype(jnp.float32)
    loss = jnp.sum((r - x) ** 2, axis=-1)
    return jnp.mean(loss) if batch_averaged else jnp.sum(loss)


if __name__ == "__main__":
    key = jax.random.PRNGKey(0)
    k1, k2, k3, k4, k5, k6 = jax.random.split(key, 6)

    # 1) Module-typical shape [b, channels, ih, iw] -> fast (rows, 128) path.
    shape = (2, 4, 16, 16)
    recon = jax.random.normal(k1, shape, dtype=jnp.float32)
    orig = jax.random.normal(k2, shape, dtype=jnp.float32)

    out_avg = jax.block_until_ready(
        reconstruction_loss(recon, orig, batch_averaged=True))
    ref_avg = _reference(recon, orig, batch_averaged=True)
    assert jnp.allclose(out_avg, ref_avg, rtol=1e-5, atol=1e-4), (out_avg, ref_avg)

    out_sum = jax.block_until_ready(
        reconstruction_loss(recon, orig, batch_averaged=False))
    ref_sum = _reference(recon, orig, batch_averaged=False)
    assert jnp.allclose(out_sum, ref_sum, rtol=1e-5, atol=1e-4), (out_sum, ref_sum)

    # 2) Fast path with multi-chunk parallel grid + tail masking + clamped
    #    overflow tiles (tiny tiles to force every code path at small shape).
    shape2 = (2, 4, 16, 20)   # 2560 elems -> 20 rows of 128 lanes
    r2 = jax.random.normal(k3, shape2, dtype=jnp.float32)
    o2 = jax.random.normal(k4, shape2, dtype=jnp.float32)
    out2 = jax.block_until_ready(
        reconstruction_loss(r2, o2, batch_averaged=True,
                            row_tile=8, num_partials=2))
    ref2 = _reference(r2, o2, batch_averaged=True)
    assert jnp.allclose(out2, ref2, rtol=1e-5, atol=1e-4), (out2, ref2)

    # 3) Fallback path (total elems not a multiple of 128).
    shape3 = (2, 3, 5, 7)     # 210 elems
    r3 = jax.random.normal(k5, shape3, dtype=jnp.float32)
    o3 = jax.random.normal(k6, shape3, dtype=jnp.float32)
    out3 = jax.block_until_ready(
        reconstruction_loss(r3, o3, batch_averaged=False))
    ref3 = _reference(r3, o3, batch_averaged=False)
    assert jnp.allclose(out3, ref3, rtol=1e-5, atol=1e-4), (out3, ref3)

    print("KERNEL_OK")
</pallas_src>

<mosaic_0001>
module attributes {stable_mosaic.version = 11 : i64} {
  func.func @_recon_loss_rows_kernel(%arg0: i32, %arg1: i32, %arg2: memref<16x128xf32, #tpu.memory_space<vmem>>, %arg3: memref<16x128xf32, #tpu.memory_space<vmem>>, %arg4: memref<1x1xf32, #tpu.memory_space<smem>>, %arg5: memref<1x128xf32, #tpu.memory_space<vmem>>) attributes {dimension_semantics = [#tpu.dimension_semantics<parallel>, #tpu.dimension_semantics<arbitrary>], iteration_bounds = array<i64: 1, 1>, scalar_prefetch = 0 : i64, scratch_operands = 1 : i64, tpu.core_type = #tpu.core_type<tc>, window_params = [{transform_indices = @transform_0, window_bounds = array<i64: 16, 128>}, {transform_indices = @transform_1, window_bounds = array<i64: 16, 128>}, {transform_indices = @transform_2, window_bounds = array<i64: 1, 1>}]} {
    %c0_i32 = arith.constant 0 : i32
    %0 = arith.cmpi eq, %arg1, %c0_i32 : i32
    %1 = arith.extui %0 : i1 to i32
    %c0_i32_0 = arith.constant 0 : i32
    %2 = arith.cmpi ne, %1, %c0_i32_0 : i32
    scf.if %2 {
      %cst_10 = arith.constant 0.000000e+00 : f32
      %15 = vector.broadcast %cst_10 : f32 to vector<1x128xf32>
      %c0_11 = arith.constant 0 : index
      %c0_12 = arith.constant 0 : index
      %16 = vector.load %arg5[%c0_11, %c0_12] : memref<1x128xf32, #tpu.memory_space<vmem>>, vector<1x128xf32>
      tpu.vector_store %arg5[%c0_11, %c0_12], %15 {strides = array<i32>} : memref<1x128xf32, #tpu.memory_space<vmem>>, vector<1x128xf32>,
    } else {
    }
    %c0 = arith.constant 0 : index
    %c0_1 = arith.constant 0 : index
    %3 = vector.load %arg2[%c0, %c0_1] : memref<16x128xf32, #tpu.memory_space<vmem>>, vector<16x128xf32>
    %c0_2 = arith.constant 0 : index
    %c0_3 = arith.constant 0 : index
    %4 = vector.load %arg3[%c0_2, %c0_3] : memref<16x128xf32, #tpu.memory_space<vmem>>, vector<16x128xf32>
    %5 = arith.subf %3, %4 : vector<16x128xf32>
    %c0_4 = arith.constant 0 : index
    %c0_5 = arith.constant 0 : index
    %6 = vector.load %arg5[%c0_4, %c0_5] : memref<1x128xf32, #tpu.memory_space<vmem>>, vector<1x128xf32>
    %7 = arith.mulf %5, %5 : vector<16x128xf32>
    %cst = arith.constant dense<0.000000e+00> : vector<128xf32>
    %8 = vector.multi_reduction <add>, %7, %cst [0] : vector<16x128xf32> to vector<128xf32>
    %9 = vector.shape_cast %8 : vector<128xf32> to vector<1x128xf32>
    %10 = arith.addf %6, %9 : vector<1x128xf32>
    %c0_6 = arith.constant 0 : index
    %c0_7 = arith.constant 0 : index
    %11 = vector.load %arg5[%c0_6, %c0_7] : memref<1x128xf32, #tpu.memory_space<vmem>>, vector<1x128xf32>
    tpu.vector_store %arg5[%c0_6, %c0_7], %10 {strides = array<i32>} : memref<1x128xf32, #tpu.memory_space<vmem>>, vector<1x128xf32>,
    %c0_i32_8 = arith.constant 0 : i32
    %12 = arith.cmpi eq, %arg1, %c0_i32_8 : i32
    %13 = arith.extui %12 : i1 to i32
    %c0_i32_9 = arith.constant 0 : i32
    %14 = arith.cmpi ne, %13, %c0_i32_9 : i32
    scf.if %14 {
      %c0_10 = arith.constant 0 : index
      %c0_11 = arith.constant 0 : index
      %15 = vector.load %arg5[%c0_10, %c0_11] : memref<1x128xf32, #tpu.memory_space<vmem>>, vector<1x128xf32>
      %16 = vector.shape_cast %15 : vector<1x128xf32> to vector<1x1x128xf32>
      %cst_12 = arith.constant dense<0.000000e+00> : vector<1xf32>
      %17 = vector.multi_reduction <add>, %16, %cst_12 [1, 2] : vector<1x1x128xf32> to vector<1xf32>
      %18 = vector.shape_cast %17 : vector<1xf32> to vector<1x1x1xf32>
      %19 = vector.extract %18[0, 0, 0] : f32 from vector<1x1x1xf32>
      %c0_13 = arith.constant 0 : index
      %c0_14 = arith.constant 0 : index
      %20 = memref.load %arg4[%c0_13, %c0_14] : memref<1x1xf32, #tpu.memory_space<smem>>
      memref.store %19, %arg4[%c0_13, %c0_14] : memref<1x1xf32, #tpu.memory_space<smem>>
    } else {
    }
    return
  }
  func.func @transform_0(%arg0: i32, %arg1: i32) -> (i32, i32) {
    %c1_i32 = arith.constant 1 : i32
    %0 = arith.muli %arg0, %c1_i32 : i32
    %1 = arith.addi %0, %arg1 : i32
    %c0_i32 = arith.constant 0 : i32
    %c0_i32_0 = arith.constant 0 : i32
    return %1, %c0_i32 : i32, i32
  }
  func.func @transform_1(%arg0: i32, %arg1: i32) -> (i32, i32) {
    %c1_i32 = arith.constant 1 : i32
    %0 = arith.muli %arg0, %c1_i32 : i32
    %1 = arith.addi %0, %arg1 : i32
    %c0_i32 = arith.constant 0 : i32
    %c0_i32_0 = arith.constant 0 : i32
    return %1, %c0_i32 : i32, i32
  }
  func.func @transform_2(%arg0: i32, %arg1: i32) -> (i32, i32) {
    %c0_i32 = arith.constant 0 : i32
    %c0_i32_0 = arith.constant 0 : i32
    return %arg0, %c0_i32 : i32, i32
  }
}

</mosaic_0001>

<bundles_post_ra>
// kernel: tpu_custom_call.1
= control target key start
LH: loop header
LB: loop body
LE: loop exit
PB: predicated region body
PF: predicated region fallthrough
CT: control target
= control target key end

     0   :  { %7 = vsyncpa [#allocation4], 0  ;;  %s217_s0 = inlined_call_operand.hbm [shape: f32[16,128], index: 0, kind: input, shape index: {}]   ;;  %s218_s1 = inlined_call_operand.hbm [shape: f32[16,128], index: 1, kind: input, shape index: {}]   ;;  %s219_s2 = inlined_call_operand.hbm [shape: f32[1,1], index: 2, kind: output, shape index: {}]  }
   0x1   :  { %8 = vsyncpa [#allocation7], 0 }
   0x2   :  { %9 = vsyncpa [#allocation5], 0  ;;  %s18_s11 = sshll.u32 %s217_s0, 4  ;;  %s187_s12 = smov [#allocation3]   ;;  %s19_s11 = int_to_ptr.hbm [resolvable:$true] %s18_s11 }
   0x3   :  { %s20_s13 = sshll.u32 %s187_s12, 4  ;;  %s35_s16 = sshll.u32 %s218_s1, 4  ;;  %s21_s13 = int_to_ptr.vmem [resolvable:$true] %s20_s13  ;;  %s36_s16 = int_to_ptr.hbm [resolvable:$true] %s35_s16 }
   0x4   :  { %s188_s17 = smov 128   ;;  %s189_s18 = smov 8  }
   0x5   :  { %26 = dma.hbm_to_vmem [thread:$0]  %s19_s11, 256, %s21_s13, [#allocation4], %s188_s17, %s188_s17, %s189_s18  }
   0x6   :  { %s190_s19 = smov [#allocation6]  }
   0x7   :  { %s37_s20 = sshll.u32 %s190_s19, 4  ;;  %s38_s20 = int_to_ptr.vmem [resolvable:$true] %s37_s20 }
   0x8   :  { %43 = dma.hbm_to_vmem [thread:$0]  %s36_s16, 256, %s38_s20, [#allocation7], %s188_s17, %s188_s17, %s189_s18  }
   0x9   :  { %181 = dma.done.wait [#allocation4], 256  }
   0xa   :  { %182 = vsyncadd [#allocation4], 4294967040 }
   0xb   :  { %183 = dma.done.wait [#allocation7], 256  }
   0xc   :  { %184 = vsyncadd [#allocation7], 4294967040  ;;  %v191_v0 = vmov 0.0   ;;  %v61_v1 = vld [vmem:[#allocation3] sm:$0xff]  ;;  %v62_v2 = vld [vmem:[#allocation3 + $0x8] sm:$0xff]  ;;  %vm83_vm0 = vcmask 1040384  }
   0xd   :  { %60 = vst [vmem:[#allocation2] sm:$0x1] %v191_v0  ;;  %v63_v3 = vld [vmem:[#allocation6] sm:$0xff]  ;;  %v64_v4 = vld [vmem:[#allocation6 + $0x8] sm:$0xff]  ;;  %s101_s21 = sshll.u32 %s219_s2, 4  ;;  %s192_s23 = smov [#allocation8]   ;;  %s102_s21 = int_to_ptr.hbm [resolvable:$true] %s101_s21 }
   0xe   :  { %v65_v5 = vsub.f32 %v61_v1, %v63_v3  ;;  %v66_v6 = vsub.f32 %v62_v2, %v64_v4 }
  0x10   :  { %v68_v7 = vmul.f32 %v65_v5, %v65_v5  ;;  %v69_v8 = vmul.f32 %v66_v6, %v66_v6 }
  0x12   :  { %v70_v9 = vadd.f32 %v69_v8, %v68_v7 }
  0x14   :  { %v71_v10 = vrot.slane %v70_v9, 4  ;;  %v67_v15 = vld [vmem:[#allocation2] sm:$0x1] }
  0x16   :  { %v72_v11 = vadd.f32 %v71_v10, %v70_v9 }
  0x18   :  { %v73_v12 = vrot.slane %v72_v11, 2 }
  0x1a   :  { %v74_v13 = vadd.f32 %v73_v12, %v72_v11 }
  0x1c   :  { %v75_v14 = vrot.slane %v74_v13, 1 }
  0x1e   :  { %v76_v16 = vadd.f32 %v75_v14, %v74_v13 }
  0x20   :  { %v77_v17 = vadd.f32 %v76_v16, %v67_v15 }
  0x22   :  { %78 = vst [vmem:[#allocation2] sm:$0x1] %v77_v17 }
  0x29   :  { %v82_v18 = vld [vmem:[#allocation2] sm:$0x1] }
  0x2a   :  { %v84_v19 = vsel %vm83_vm0, %v82_v18, 0.0 }
  0x2b   :  { %85 = vadd.xlane.f32.xlu0 %v84_v19 }
  0x9e   :  { %v86_v20 = vpop.xlane.xlu0 %85 }
  0x9f   :  { %v87_v21 = vrot.slane %v86_v20, 4 }
  0xa1   :  { %v88_v22 = vadd.f32 %v87_v21, %v86_v20 }
  0xa3   :  { %v89_v23 = vrot.slane %v88_v22, 2 }
  0xa5   :  { %v90_v24 = vadd.f32 %v89_v23, %v88_v22 }
  0xa7   :  { %v91_v25 = vrot.slane %v90_v24, 1 }
  0xa9   :  { %v92_v26 = vadd.f32 %v91_v25, %v90_v24 }
  0xab   :  { %113 = vpush %v92_v26 }
  0xdc   :  { %s114_s22 = spop %113 }
  0xdd   :  { %95 = sst [smem:[#allocation8]] %s114_s22 }
  0xde   :  { %104 = dma.smem_to_hbm %s192_s23, 16, %s102_s21, [#allocation5]  }
  0xdf   :  { %185 = dma.done.wait [#allocation5], 16  }
  0xe0   :  { %186 = vsyncadd [#allocation5], 4294967280 }
  0xe1   :  { %109 = sfence }
  0xe2   :  { %110 = vsyncpa [#allocation4], 1 }
  0xe3   :  { %111 = vsyncpa [#allocation7], 1 }
  0xe4   :  { %112 = vsyncpa [#allocation5], 1 }

</bundles_post_ra>
